<compile_context>
chip_gen: v7x
topology: tpu7x:2x2x1
jax: 0.10.0
libtpu: 0.0.40
codegen_flags: <defaults>
</compile_context>

<pallas_src>
import math

import jax
import jax.numpy as jnp
from jax.experimental import pallas as pl
from jax.experimental.pallas import tpu as pltpu

N_PAD = 128  # lane-dense padding of the final (out_features=1) layer
SUB = 16     # sublane granule satisfying both f32 (8) and bf16 (16) tiling


def _leaky_relu(x, slope=0.2):
    return jnp.where(x > 0, x, slope * x)


def _round_up(n, m):
    return ((n + m - 1) // m) * m


def _pick_batch_tiling(B, tb_max=256):
    """Pick (TB, B_pad): TB multiple of SUB, <= tb_max, grid >= 2 and even when possible."""
    Bg = _round_up(B, SUB)
    TB = min(tb_max, Bg)
    steps = pl.cdiv(Bg, TB)
    if steps == 1 and TB > 128:
        steps = 2            # split a single big tile -> pipelining + megacore
    elif steps > 1 and steps % 2 == 1:
        steps += 1           # even tile count -> balanced split across v7x's 2 TCs
    TB = _round_up(pl.cdiv(Bg, steps), SUB)
    B_pad = _round_up(B, TB)
    return TB, B_pad


def discriminator_kernel(x_ref, w1_ref, b1_ref, w2_ref, b2_ref, w3_ref, b3_ref, o_ref):
    # Cast x to bf16 in VMEM (VPU); avoids a separate padded/cast HBM copy in the wrapper.
    x = x_ref[...].astype(jnp.bfloat16)
    # Layer 1: (TB, D) bf16 @ (D, 512) bf16 -> f32 acc; bias + LeakyReLU in f32.
    h1 = jnp.dot(x, w1_ref[...], preferred_element_type=jnp.float32) + b1_ref[...]
    h1 = _leaky_relu(h1).astype(jnp.bfloat16)
    # Layer 2: (TB, 512) @ (512, 256)
    h2 = jnp.dot(h1, w2_ref[...], preferred_element_type=jnp.float32) + b2_ref[...]
    h2 = _leaky_relu(h2).astype(jnp.bfloat16)
    # Layer 3: (TB, 256) @ (256, 128) -- lane-dense padded; real logit is column 0.
    h3 = jnp.dot(h2, w3_ref[...], preferred_element_type=jnp.float32) + b3_ref[...]
    # Raw bf16 logits (lane-dense unmasked store); sigmoid applied on the (B,1) slice outside.
    o_ref[...] = h3.astype(jnp.bfloat16)


def discriminator_forward(img, params, *, tb_max=256):
    """img: (B, C, H, W) float32; returns validity (B, 1) float32."""
    w1, b1, w2, b2, w3, b3 = params
    B = img.shape[0]
    D = math.prod(img.shape[1:])
    x = img.reshape(B, D).astype(jnp.float32)

    TB, B_pad = _pick_batch_tiling(B, tb_max)
    if B_pad != B:
        # Only when B isn't tile-aligned; waste bounded by < TB rows. Zero rows are benign.
        x = jnp.zeros((B_pad, D), x.dtype).at[:B].set(x)

    # Small, resident operands: bf16 weights, f32 biases; final layer padded to 128 lanes.
    w1_b = w1.astype(jnp.bfloat16)
    w2_b = w2.astype(jnp.bfloat16)
    w3_p = jnp.zeros((256, N_PAD), jnp.bfloat16).at[:, :1].set(w3.astype(jnp.bfloat16))
    b1_f = b1.astype(jnp.float32)
    b2_f = b2.astype(jnp.float32)
    b3_p = jnp.zeros((1, N_PAD), jnp.float32).at[:, :1].set(b3.astype(jnp.float32))

    grid = (B_pad // TB,)

    # Resident (non-tiled) operands: constant block index across the batch grid.
    resident = lambda shape: pl.BlockSpec(shape, lambda i, _s=len(shape): (0,) * _s)

    flops = 2 * B_pad * (D * 512 + 512 * 256 + 256 * N_PAD)
    bytes_accessed = (
        x.size * 4                                        # f32 input read
        + (w1_b.size + w2_b.size + w3_p.size) * 2         # bf16 weights
        + (b1_f.size + b2_f.size + b3_p.size) * 4         # f32 biases
        + B_pad * N_PAD * 2                               # bf16 logit writeback
    )
    cost = pl.CostEstimate(flops=flops, transcendentals=0, bytes_accessed=bytes_accessed)

    logits = pl.pallas_call(
        discriminator_kernel,
        out_shape=jax.ShapeDtypeStruct((B_pad, N_PAD), jnp.bfloat16),
        grid=grid,
        in_specs=[
            pl.BlockSpec((TB, D), lambda i: (i, 0)),      # x: tiled over batch, full K
            resident(w1_b.shape), resident(b1_f.shape),
            resident(w2_b.shape), resident(b2_f.shape),
            resident(w3_p.shape), resident(b3_p.shape),
        ],
        out_specs=pl.BlockSpec((TB, N_PAD), lambda i: (i, 0)),
        compiler_params=pltpu.CompilerParams(dimension_semantics=("parallel",)),
        cost_estimate=cost,
    )(x, w1_b, b1_f, w2_b, b2_f, w3_p, b3_p)

    # Sigmoid in f32 on the tiny useful slice (column 0, first B rows).
    return jax.nn.sigmoid(logits[:B, :1].astype(jnp.float32))


def init_params(key, in_dim):
    """Deterministic parameter init; weights stored as (in, out), biases (1, out)."""
    k1, k2, k3, k4, k5, k6 = jax.random.split(key, 6)
    scale = lambda fan_in: 1.0 / jnp.sqrt(fan_in)
    w1 = jax.random.uniform(k1, (in_dim, 512), jnp.float32, -scale(in_dim), scale(in_dim))
    b1 = jax.random.uniform(k2, (1, 512), jnp.float32, -scale(in_dim), scale(in_dim))
    w2 = jax.random.uniform(k3, (512, 256), jnp.float32, -scale(512), scale(512))
    b2 = jax.random.uniform(k4, (1, 256), jnp.float32, -scale(512), scale(512))
    w3 = jax.random.uniform(k5, (256, 1), jnp.float32, -scale(256), scale(256))
    b3 = jax.random.uniform(k6, (1, 1), jnp.float32, -scale(256), scale(256))
    return (w1, b1, w2, b2, w3, b3)


def reference_forward(img, params):
    """Pure-JAX f32 reference (matches the PyTorch module)."""
    w1, b1, w2, b2, w3, b3 = params
    x = img.reshape(img.shape[0], -1)
    h1 = _leaky_relu(x @ w1 + b1)
    h2 = _leaky_relu(h1 @ w2 + b2)
    return jax.nn.sigmoid(h2 @ w3 + b3)


if __name__ == "__main__":
    # Small shapes consistent with the module: img_shape = (1, 16, 16) -> D = 256
    B, C, H, W = 8, 1, 16, 16
    key = jax.random.PRNGKey(0)
    k_img, k_params = jax.random.split(key)

    img = jax.random.normal(k_img, (B, C, H, W), jnp.float32)
    params = init_params(k_params, C * H * W)

    out = discriminator_forward(img, params)
    out = jax.block_until_ready(out)

    ref = reference_forward(img, params)
    assert out.shape == (B, 1)
    # bf16 matmul operands / bf16 logits (f32 accumulation) -> loosened tolerance vs f32 ref.
    assert jnp.allclose(out, ref, atol=2e-2, rtol=0.0), float(jnp.max(jnp.abs(out - ref)))
    print("KERNEL_OK")
</pallas_src>

<mosaic_0001>
module attributes {stable_mosaic.version = 11 : i64} {
  func.func @discriminator_kernel(%arg0: i32, %arg1: memref<16x256xf32, #tpu.memory_space<vmem>>, %arg2: memref<256x512xbf16, #tpu.memory_space<vmem>>, %arg3: memref<1x512xf32, #tpu.memory_space<vmem>>, %arg4: memref<512x256xbf16, #tpu.memory_space<vmem>>, %arg5: memref<1x256xf32, #tpu.memory_space<vmem>>, %arg6: memref<256x128xbf16, #tpu.memory_space<vmem>>, %arg7: memref<1x128xf32, #tpu.memory_space<vmem>>, %arg8: memref<16x128xbf16, #tpu.memory_space<vmem>>) attributes {dimension_semantics = [#tpu.dimension_semantics<parallel>], iteration_bounds = array<i64: 1>, scalar_prefetch = 0 : i64, scratch_operands = 0 : i64, tpu.core_type = #tpu.core_type<tc>, window_params = [{transform_indices = @transform_0, window_bounds = array<i64: 16, 256>}, {pipeline_mode = #tpu.pipeline_mode<synchronous>, transform_indices = @transform_1, window_bounds = array<i64: 256, 512>}, {pipeline_mode = #tpu.pipeline_mode<synchronous>, transform_indices = @transform_2, window_bounds = array<i64: 1, 512>}, {pipeline_mode = #tpu.pipeline_mode<synchronous>, transform_indices = @transform_3, window_bounds = array<i64: 512, 256>}, {pipeline_mode = #tpu.pipeline_mode<synchronous>, transform_indices = @transform_4, window_bounds = array<i64: 1, 256>}, {pipeline_mode = #tpu.pipeline_mode<synchronous>, transform_indices = @transform_5, window_bounds = array<i64: 256, 128>}, {pipeline_mode = #tpu.pipeline_mode<synchronous>, transform_indices = @transform_6, window_bounds = array<i64: 1, 128>}, {transform_indices = @transform_7, window_bounds = array<i64: 16, 128>}]} {
    %c0 = arith.constant 0 : index
    %c0_0 = arith.constant 0 : index
    %0 = vector.load %arg1[%c0, %c0_0] : memref<16x256xf32, #tpu.memory_space<vmem>>, vector<16x256xf32>
    %1 = arith.truncf %0 : vector<16x256xf32> to vector<16x256xbf16>
    %c0_1 = arith.constant 0 : index
    %c0_2 = arith.constant 0 : index
    %2 = vector.load %arg2[%c0_1, %c0_2] : memref<256x512xbf16, #tpu.memory_space<vmem>>, vector<256x512xbf16>
    %cst = arith.constant dense<0.000000e+00> : vector<16x512xf32>
    %3 = tpu.matmul %1, %2, %cst {dimension_numbers = #tpu.dot_dimension_numbers<[1], [0], [0], [1], [0, 0, 1, 1], [], []>} : vector<16x256xbf16>, vector<256x512xbf16>, vector<16x512xf32> -> vector<16x512xf32>
    %c0_3 = arith.constant 0 : index
    %c0_4 = arith.constant 0 : index
    %4 = vector.load %arg3[%c0_3, %c0_4] : memref<1x512xf32, #tpu.memory_space<vmem>>, vector<1x512xf32>
    %5 = vector.broadcast %4 : vector<1x512xf32> to vector<16x512xf32>
    %6 = arith.addf %3, %5 : vector<16x512xf32>
    %cst_5 = arith.constant 0.000000e+00 : f32
    %7 = vector.broadcast %cst_5 : f32 to vector<16x512xf32>
    %8 = arith.cmpf ogt, %6, %7 : vector<16x512xf32>
    %cst_6 = arith.constant 2.000000e-01 : f32
    %9 = vector.broadcast %cst_6 : f32 to vector<16x512xf32>
    %10 = arith.mulf %9, %6 : vector<16x512xf32>
    %11 = arith.select %8, %6, %10 : vector<16x512xi1>, vector<16x512xf32>
    %12 = arith.truncf %11 : vector<16x512xf32> to vector<16x512xbf16>
    %c0_7 = arith.constant 0 : index
    %c0_8 = arith.constant 0 : index
    %13 = vector.load %arg4[%c0_7, %c0_8] : memref<512x256xbf16, #tpu.memory_space<vmem>>, vector<512x256xbf16>
    %cst_9 = arith.constant dense<0.000000e+00> : vector<16x256xf32>
    %14 = tpu.matmul %12, %13, %cst_9 {dimension_numbers = #tpu.dot_dimension_numbers<[1], [0], [0], [1], [0, 0, 1, 1], [], []>} : vector<16x512xbf16>, vector<512x256xbf16>, vector<16x256xf32> -> vector<16x256xf32>
    %c0_10 = arith.constant 0 : index
    %c0_11 = arith.constant 0 : index
    %15 = vector.load %arg5[%c0_10, %c0_11] : memref<1x256xf32, #tpu.memory_space<vmem>>, vector<1x256xf32>
    %16 = vector.broadcast %15 : vector<1x256xf32> to vector<16x256xf32>
    %17 = arith.addf %14, %16 : vector<16x256xf32>
    %cst_12 = arith.constant 0.000000e+00 : f32
    %18 = vector.broadcast %cst_12 : f32 to vector<16x256xf32>
    %19 = arith.cmpf ogt, %17, %18 : vector<16x256xf32>
    %cst_13 = arith.constant 2.000000e-01 : f32
    %20 = vector.broadcast %cst_13 : f32 to vector<16x256xf32>
    %21 = arith.mulf %20, %17 : vector<16x256xf32>
    %22 = arith.select %19, %17, %21 : vector<16x256xi1>, vector<16x256xf32>
    %23 = arith.truncf %22 : vector<16x256xf32> to vector<16x256xbf16>
    %c0_14 = arith.constant 0 : index
    %c0_15 = arith.constant 0 : index
    %24 = vector.load %arg6[%c0_14, %c0_15] : memref<256x128xbf16, #tpu.memory_space<vmem>>, vector<256x128xbf16>
    %cst_16 = arith.constant dense<0.000000e+00> : vector<16x128xf32>
    %25 = tpu.matmul %23, %24, %cst_16 {dimension_numbers = #tpu.dot_dimension_numbers<[1], [0], [0], [1], [0, 0, 1, 1], [], []>} : vector<16x256xbf16>, vector<256x128xbf16>, vector<16x128xf32> -> vector<16x128xf32>
    %c0_17 = arith.constant 0 : index
    %c0_18 = arith.constant 0 : index
    %26 = vector.load %arg7[%c0_17, %c0_18] : memref<1x128xf32, #tpu.memory_space<vmem>>, vector<1x128xf32>
    %27 = vector.broadcast %26 : vector<1x128xf32> to vector<16x128xf32>
    %28 = arith.addf %25, %27 : vector<16x128xf32>
    %29 = arith.truncf %28 : vector<16x128xf32> to vector<16x128xbf16>
    %c0_19 = arith.constant 0 : index
    %c0_20 = arith.constant 0 : index
    %30 = vector.load %arg8[%c0_19, %c0_20] : memref<16x128xbf16, #tpu.memory_space<vmem>>, vector<16x128xbf16>
    tpu.vector_store %arg8[%c0_19, %c0_20], %29 {strides = array<i32>} : memref<16x128xbf16, #tpu.memory_space<vmem>>, vector<16x128xbf16>,
    return
  }
  func.func @transform_0(%arg0: i32) -> (i32, i32) {
    %c0_i32 = arith.constant 0 : i32
    %c0_i32_0 = arith.constant 0 : i32
    return %arg0, %c0_i32 : i32, i32
  }
  func.func @transform_1(%arg0: i32) -> (i32, i32) {
    %c0_i32 = arith.constant 0 : i32
    %c0_i32_0 = arith.constant 0 : i32
    %c0_i32_1 = arith.constant 0 : i32
    return %c0_i32, %c0_i32_0 : i32, i32
  }
  func.func @transform_2(%arg0: i32) -> (i32, i32) {
    %c0_i32 = arith.constant 0 : i32
    %c0_i32_0 = arith.constant 0 : i32
    %c0_i32_1 = arith.constant 0 : i32
    return %c0_i32, %c0_i32_0 : i32, i32
  }
  func.func @transform_3(%arg0: i32) -> (i32, i32) {
    %c0_i32 = arith.constant 0 : i32
    %c0_i32_0 = arith.constant 0 : i32
    %c0_i32_1 = arith.constant 0 : i32
    return %c0_i32, %c0_i32_0 : i32, i32
  }
  func.func @transform_4(%arg0: i32) -> (i32, i32) {
    %c0_i32 = arith.constant 0 : i32
    %c0_i32_0 = arith.constant 0 : i32
    %c0_i32_1 = arith.constant 0 : i32
    return %c0_i32, %c0_i32_0 : i32, i32
  }
  func.func @transform_5(%arg0: i32) -> (i32, i32) {
    %c0_i32 = arith.constant 0 : i32
    %c0_i32_0 = arith.constant 0 : i32
    %c0_i32_1 = arith.constant 0 : i32
    return %c0_i32, %c0_i32_0 : i32, i32
  }
  func.func @transform_6(%arg0: i32) -> (i32, i32) {
    %c0_i32 = arith.constant 0 : i32
    %c0_i32_0 = arith.constant 0 : i32
    %c0_i32_1 = arith.constant 0 : i32
    return %c0_i32, %c0_i32_0 : i32, i32
  }
  func.func @transform_7(%arg0: i32) -> (i32, i32) {
    %c0_i32 = arith.constant 0 : i32
    %c0_i32_0 = arith.constant 0 : i32
    return %arg0, %c0_i32 : i32, i32
  }
}

</mosaic_0001>

<bundles_post_ra>
// kernel: tpu_custom_call.1
= control target key start
LH: loop header
LB: loop body
LE: loop exit
PB: predicated region body
PF: predicated region fallthrough
CT: control target
= control target key end

     0   :  { %12 = vsyncpa [#allocation3], 0  ;;  %s1992_s0 = inlined_call_operand.hbm [shape: f32[16,256], index: 0, kind: input, shape index: {}]   ;;  %s1993_s1 = inlined_call_operand.hbm [shape: bf16[256,512], index: 1, kind: input, shape index: {}]   ;;  %s1994_s2 = inlined_call_operand.vmem [shape: f32[1,512], index: 2, kind: input, shape index: {}]   ;;  %s1995_s3 = inlined_call_operand.hbm [shape: bf16[512,256], index: 3, kind: input, shape index: {}]   ;;  %s1996_s4 = inlined_call_operand.vmem [shape: f32[1,256], index: 4, kind: input, shape index: {}]   ;;  %s1997_s5 = inlined_call_operand.hbm [shape: bf16[256,128], index: 5, kind: input, shape index: {}]   ;;  %s1998_s6 = inlined_call_operand.vmem [shape: f32[1,128], index: 6, kind: input, shape index: {}]   ;;  %s1999_s7 = inlined_call_operand.hbm [shape: bf16[16,128], index: 7, kind: output, shape index: {}]  }
   0x1   :  { %13 = vsyncpa [#allocation6], 0 }
   0x2   :  { %14 = vsyncpa [#allocation9], 0 }
   0x3   :  { %15 = vsyncpa [#allocation4], 0  ;;  %s1831_s24 = smov [#allocation5]   ;;  %s1832_s26 = smov [#allocation2]  }
   0x4   :  { %s33_s25 = sshll.u32 %s1831_s24, 4  ;;  %s21_s27 = sshll.u32 %s1832_s26, 4  ;;  %s34_s25 = int_to_ptr.vmem [resolvable:$true] %s33_s25  ;;  %s1882_s27 = int_to_ptr.vmem [resolvable:$true] %s21_s27 }
   0x5   :  { %s1713_s30 = scalar_lea.hbm %s1993_s1, 8192 }
   0x6   :  { %p1714_p0 = scmp.ne.s32.totalorder %s1993_s1, %s1713_s30  ;;  %p1717_p1 = scmp.lt.u32.totalorder %s1713_s30, %s1993_s1 }
   0x8   :  { %p1719_p2 = pnand %p1717_p1, %p1714_p0 }
   0xa   :  { %1722 = shalt.err (!%p1719_p2)
}
   0xb   :  { %s1723_s12 = scalar_lea.vmem %s34_s25, 8192  ;;  %p1728_p4 = scmp.lt.s32.totalorder %s34_s25, %s34_s25 }
   0xc   :  { %p1724_p3 = scmp.ne.s32.totalorder %s34_s25, %s1723_s12  ;;  %p1729_p5 = scmp.lt.s32.totalorder %s1723_s12, %s1723_s12 }
   0xe   :  { %p1730_p6 = por %p1729_p5, %p1728_p4 }
  0x10   :  { %p1731_p7 = pnand %p1730_p6, %p1724_p3 }
  0x12   :  { %1734 = shalt.err (!%p1731_p7)
}
  0x13   :  { %s1833_s13 = smov 256   ;;  %s1834_s14 = smov 16  }
  0x14   :  { %39 = dma.hbm_to_vmem [thread:$0]  %s1993_s1, 8192, %s34_s25, [#allocation6], %s1833_s13, %s1833_s13, %s1834_s14  }
  0x15   :  { %s1735_s19 = scalar_lea.hbm %s1992_s0, 512 }
  0x16   :  { %p1736_p8 = scmp.ne.s32.totalorder %s1992_s0, %s1735_s19  ;;  %p1739_p9 = scmp.lt.u32.totalorder %s1735_s19, %s1992_s0 }
  0x18   :  { %p1741_p10 = pnand %p1739_p9, %p1736_p8 }
  0x1a   :  { %1744 = shalt.err (!%p1741_p10)
}
  0x1b   :  { %s1745_s24 = scalar_lea.vmem %s1882_s27, 512  ;;  %p1750_p12 = scmp.lt.s32.totalorder %s1882_s27, %s1882_s27 }
  0x1c   :  { %p1746_p11 = scmp.ne.s32.totalorder %s1882_s27, %s1745_s24  ;;  %p1751_p13 = scmp.lt.s32.totalorder %s1745_s24, %s1745_s24 }
  0x1e   :  { %p1752_p0 = por %p1751_p13, %p1750_p12 }
  0x20   :  { %p1753_p1 = pnand %p1752_p0, %p1746_p11 }
  0x22   :  { %1756 = shalt.err (!%p1753_p1)
}
  0x23   :  { %27 = dma.hbm_to_vmem [thread:$0]  %s1992_s0, 512, %s1882_s27, [#allocation3], %s1833_s13, %s1833_s13, %s1834_s14  }
  0x24   :  { %s1835_s26 = smov [#allocation7]   ;;  %s1757_s8 = scalar_lea.hbm %s1995_s3, 8192 }
  0x25   :  { %s47_s28 = sshll.u32 %s1835_s26, 4  ;;  %p1758_p2 = scmp.ne.s32.totalorder %s1995_s3, %s1757_s8  ;;  %s48_s28 = int_to_ptr.vmem [resolvable:$true] %s47_s28 }
  0x26   :  { %p1761_p3 = scmp.lt.u32.totalorder %s1757_s8, %s1995_s3 }
  0x28   :  { %p1763_p4 = pnand %p1761_p3, %p1758_p2 }
  0x2a   :  { %1766 = shalt.err (!%p1763_p4)
}
  0x2b   :  { %s1767_s15 = scalar_lea.vmem %s48_s28, 8192  ;;  %p1772_p6 = scmp.lt.s32.totalorder %s48_s28, %s48_s28 }
  0x2c   :  { %p1768_p5 = scmp.ne.s32.totalorder %s48_s28, %s1767_s15  ;;  %p1773_p7 = scmp.lt.s32.totalorder %s1767_s15, %s1767_s15 }
  0x2e   :  { %p1774_p8 = por %p1773_p7, %p1772_p6 }
  0x30   :  { %p1775_p9 = pnand %p1774_p8, %p1768_p5 }
  0x32   :  { %1778 = shalt.err (!%p1775_p9)
}
  0x33   :  { %s1836_s0 = smov 128   ;;  %s1837_s27 = smov 8  }
  0x34   :  { %53 = dma.hbm_to_vmem [thread:$0]  %s1995_s3, 8192, %s48_s28, [#allocation6], %s1836_s0, %s1836_s0, %s1837_s27  }
  0x35   :  { %s1838_s16 = smov [#allocation8]   ;;  %s1779_s20 = scalar_lea.hbm %s1997_s5, 2048 }
  0x36   :  { %s61_s17 = sshll.u32 %s1838_s16, 4  ;;  %p1780_p10 = scmp.ne.s32.totalorder %s1997_s5, %s1779_s20  ;;  %s62_s17 = int_to_ptr.vmem [resolvable:$true] %s61_s17 }
  0x37   :  { %p1783_p11 = scmp.lt.u32.totalorder %s1779_s20, %s1997_s5 }
  0x39   :  { %p1785_p12 = pnand %p1783_p11, %p1780_p10 }
  0x3b   :  { %1788 = shalt.err (!%p1785_p12)
}
  0x3c   :  { %s1789_s1 = scalar_lea.vmem %s62_s17, 2048  ;;  %p1794_p0 = scmp.lt.s32.totalorder %s62_s17, %s62_s17 }
  0x3d   :  { %p1790_p13 = scmp.ne.s32.totalorder %s62_s17, %s1789_s1  ;;  %p1795_p1 = scmp.lt.s32.totalorder %s1789_s1, %s1789_s1 }
  0x3f   :  { %p1796_p2 = por %p1795_p1, %p1794_p0 }
  0x41   :  { %p1797_p3 = pnand %p1796_p2, %p1790_p13 }
  0x43   :  { %1800 = shalt.err (!%p1797_p3)
}
  0x44   :  { %s1839_s3 = smov 64   ;;  %s1840_s25 = smov 4  }
  0x45   :  { %67 = dma.hbm_to_vmem [thread:$0]  %s1997_s5, 2048, %s62_s17, [#allocation9], %s1839_s3, %s1839_s3, %s1840_s25  }
  0x46   :  { %1823 = dma.done.wait [#allocation3], 512  }
  0x47   :  { %1824 = vsyncadd [#allocation3], 4294966784 }
  0x48   :  { %1825 = dma.done.wait [#allocation6], 16384  }
  0x49   :  { %1826 = vsyncadd [#allocation6], 4294950912 }
  0x4a   :  { %1827 = dma.done.wait [#allocation9], 2048  }
  0x4b   :  { %1828 = vsyncadd [#allocation9], 4294965248  ;;  %v1505_v0 = vld [vmem:[#allocation5 + $0x4] ss:$16 sps:$4 sm:$0xff]   ;;  %v1507_v1 = vld [vmem:[#allocation5] ss:$16 sps:$4 sm:$0xff]  }
  0x4c   :  { %495 = vmatprep.subr.bf16.mxu1 %v1505_v0  ;;  %v1508_v2 = vld [vmem:[#allocation5 + $0x24] ss:$16 sps:$4 sm:$0xff]   ;;  %v1510_v3 = vld [vmem:[#allocation5 + $0x20] ss:$16 sps:$4 sm:$0xff]   ;;  %v84_v13 = vld [vmem:[#allocation2 + $0x8] sm:$0xff]  ;;  %s1841_s9 = smov [#allocation10]  }
  0x4d   :  { %496 = vmatpush1.bf16.msra.mxu1 %v1507_v1  ;;  %v1511_v4 = vld [vmem:[#allocation5 + $0x44] ss:$16 sps:$4 sm:$0xff]   ;;  %v1513_v5 = vld [vmem:[#allocation5 + $0x40] ss:$16 sps:$4 sm:$0xff]   ;;  %v86_v14 = vld [vmem:[#allocation2 + $0x18] sm:$0xff]  ;;  %s1296_s10 = sshll.u32 %s1841_s9, 4  ;;  %s1297_s10 = int_to_ptr.vmem [resolvable:$true] %s1296_s10 }
  0x4e   :  { %497 = vmatprep.subr.bf16.mxu1 %v1508_v2  ;;  %v1514_v6 = vld [vmem:[#allocation5 + $0x64] ss:$16 sps:$4 sm:$0xff]   ;;  %v1516_v7 = vld [vmem:[#allocation5 + $0x60] ss:$16 sps:$4 sm:$0xff]   ;;  %v1940_v15 = vpack.c.bf16 %v86_v14, %v84_v13  ;;  %v1555_v46 = vld [vmem:[#allocation5 + $0xc] ss:$16 sps:$4 sm:$0xff]   ;;  %p1806_p5 = scmp.lt.s32.totalorder %s1297_s10, %s1297_s10 }
  0x4f   :  { %v1517_v8 = vld [vmem:[#allocation5 + $0x84] ss:$16 sps:$4 sm:$0xff]   ;;  %v1519_v9 = vld [vmem:[#allocation5 + $0x80] ss:$16 sps:$4 sm:$0xff]   ;;  %v1553_v49 = vld [vmem:[#allocation5 + $0x8] ss:$16 sps:$4 sm:$0xff]  }
  0x50   :  { %v1520_v10 = vld [vmem:[#allocation5 + $0xa4] ss:$16 sps:$4 sm:$0xff]   ;;  %v1522_v11 = vld [vmem:[#allocation5 + $0xa0] ss:$16 sps:$4 sm:$0xff]   ;;  %527 = vmatprep.mubr.bf16.mxu1 %v1940_v15  ;;  %v1558_v51 = vld [vmem:[#allocation5 + $0x2c] ss:$16 sps:$4 sm:$0xff]  }
  0x51   :  { %498 = vmatpush1.bf16.msra.mxu1 %v1510_v3  ;;  %v1523_v12 = vld [vmem:[#allocation5 + $0xc4] ss:$16 sps:$4 sm:$0xff]   ;;  %v1525_v16 = vld [vmem:[#allocation5 + $0xc0] ss:$16 sps:$4 sm:$0xff]   ;;  %v1556_v54 = vld [vmem:[#allocation5 + $0x28] ss:$16 sps:$4 sm:$0xff]  }
  0x52   :  { %499 = vmatprep.subr.bf16.mxu1 %v1511_v4  ;;  %v1526_v17 = vld [vmem:[#allocation5 + $0xe4] ss:$16 sps:$4 sm:$0xff]   ;;  %v1528_v18 = vld [vmem:[#allocation5 + $0xe0] ss:$16 sps:$4 sm:$0xff]   ;;  %v1561_v55 = vld [vmem:[#allocation5 + $0x4c] ss:$16 sps:$4 sm:$0xff]  }
  0x53   :  { %v1529_v19 = vld [vmem:[#allocation5 + $0x104] ss:$16 sps:$4 sm:$0xff]   ;;  %v1531_v20 = vld [vmem:[#allocation5 + $0x100] ss:$16 sps:$4 sm:$0xff]   ;;  %v1559_v58 = vld [vmem:[#allocation5 + $0x48] ss:$16 sps:$4 sm:$0xff]  }
  0x54   :  { %v1532_v21 = vld [vmem:[#allocation5 + $0x124] ss:$16 sps:$4 sm:$0xff]   ;;  %v1534_v22 = vld [vmem:[#allocation5 + $0x120] ss:$16 sps:$4 sm:$0xff]   ;;  %v1564_v59 = vld [vmem:[#allocation5 + $0x6c] ss:$16 sps:$4 sm:$0xff]  }
  0x55   :  { %500 = vmatpush1.bf16.msra.mxu1 %v1513_v5  ;;  %v1535_v23 = vld [vmem:[#allocation5 + $0x144] ss:$16 sps:$4 sm:$0xff]   ;;  %v1537_v24 = vld [vmem:[#allocation5 + $0x140] ss:$16 sps:$4 sm:$0xff]   ;;  %v1562_v62 = vld [vmem:[#allocation5 + $0x68] ss:$16 sps:$4 sm:$0xff]  }
  0x56   :  { %501 = vmatprep.subr.bf16.mxu1 %v1514_v6  ;;  %v1538_v25 = vld [vmem:[#allocation5 + $0x164] ss:$16 sps:$4 sm:$0xff]   ;;  %v1540_v26 = vld [vmem:[#allocation5 + $0x160] ss:$16 sps:$4 sm:$0xff]   ;;  %v1567_v63 = vld [vmem:[#allocation5 + $0x8c] ss:$16 sps:$4 sm:$0xff]  }
  0x57   :  { %v1541_v27 = vld [vmem:[#allocation5 + $0x184] ss:$16 sps:$4 sm:$0xff]   ;;  %v1603_v29 = vld [vmem:[#allocation7] ss:$8 sps:$4 sm:$0xff]   ;;  %v1606_v33 = vld [vmem:[#allocation7 + $0x10] ss:$8 sps:$4 sm:$0xff]  }
  0x58   :  { %v1601_v28 = vld [vmem:[#allocation7 + $0x4] ss:$8 sps:$4 sm:$0xff]   ;;  %v1543_v30 = vld [vmem:[#allocation5 + $0x180] ss:$16 sps:$4 sm:$0xff]   ;;  %v1604_v31 = vld [vmem:[#allocation7 + $0x14] ss:$8 sps:$4 sm:$0xff]  }
  0x59   :  { %502 = vmatpush1.bf16.msra.mxu1 %v1516_v7  ;;  %1005 = vmatprep.subr.bf16.mxu0 %v1601_v28  ;;  %v1544_v32 = vld [vmem:[#allocation5 + $0x1a4] ss:$16 sps:$4 sm:$0xff]   ;;  %v1546_v35 = vld [vmem:[#allocation5 + $0x1a0] ss:$16 sps:$4 sm:$0xff]   ;;  %v1565_v2 = vld [vmem:[#allocation5 + $0x88] ss:$16 sps:$4 sm:$0xff]  }
  0x5a   :  { %503 = vmatprep.subr.bf16.mxu1 %v1517_v8  ;;  %1006 = vmatpush1.bf16.msra.mxu0 %v1603_v29  ;;  %v1607_v34 = vld [vmem:[#allocation7 + $0x24] ss:$8 sps:$4 sm:$0xff]   ;;  %v1609_v37 = vld [vmem:[#allocation7 + $0x20] ss:$8 sps:$4 sm:$0xff]   ;;  %v1610_v38 = vld [vmem:[#allocation7 + $0x34] ss:$8 sps:$4 sm:$0xff]  }
  0x5b   :  { %1007 = vmatprep.subr.bf16.mxu0 %v1604_v31  ;;  %v1547_v36 = vld [vmem:[#allocation5 + $0x1c4] ss:$16 sps:$4 sm:$0xff]   ;;  %v1549_v39 = vld [vmem:[#allocation5 + $0x1c0] ss:$16 sps:$4 sm:$0xff]   ;;  %v1570_v3 = vld [vmem:[#allocation5 + $0xac] ss:$16 sps:$4 sm:$0xff]  }
  0x5c   :  { %v1550_v40 = vld [vmem:[#allocation5 + $0x1e4] ss:$16 sps:$4 sm:$0xff]   ;;  %v1612_v41 = vld [vmem:[#allocation7 + $0x30] ss:$8 sps:$4 sm:$0xff]   ;;  %v1615_v47 = vld [vmem:[#allocation7 + $0x40] ss:$8 sps:$4 sm:$0xff]  }
  0x5d   :  { %504 = vmatpush1.bf16.msra.mxu1 %v1519_v9  ;;  %v1613_v42 = vld [vmem:[#allocation7 + $0x44] ss:$8 sps:$4 sm:$0xff]   ;;  %v1552_v43 = vld [vmem:[#allocation5 + $0x1e0] ss:$16 sps:$4 sm:$0xff]   ;;  %v1616_v48 = vld [vmem:[#allocation7 + $0x54] ss:$8 sps:$4 sm:$0xff]  }
  0x5e   :  { %505 = vmatprep.subr.bf16.mxu1 %v1520_v10  ;;  %1008 = vmatpush1.bf16.msra.mxu0 %v1606_v33  ;;  %v83_v44 = vld [vmem:[#allocation2] sm:$0xff]  ;;  %v85_v45 = vld [vmem:[#allocation2 + $0x10] sm:$0xff]  ;;  %v1568_v6 = vld [vmem:[#allocation5 + $0xa8] ss:$16 sps:$4 sm:$0xff]   ;;  %s1801_s11 = scalar_lea.vmem %s1297_s10, 128 }
  0x5f   :  { %1009 = vmatprep.subr.bf16.mxu0 %v1607_v34  ;;  %v1943_v50 = vpack.c.bf16 %v85_v45, %v83_v44  ;;  %v1618_v52 = vld [vmem:[#allocation7 + $0x50] ss:$8 sps:$4 sm:$0xff]   ;;  %v1619_v53 = vld [vmem:[#allocation7 + $0x64] ss:$8 sps:$4 sm:$0xff]   ;;  %v1621_v56 = vld [vmem:[#allocation7 + $0x60] ss:$8 sps:$4 sm:$0xff]   ;;  %p1802_p4 = scmp.ne.s32.totalorder %s1297_s10, %s1801_s11  ;;  %p1807_p6 = scmp.lt.s32.totalorder %s1801_s11, %s1801_s11 }
  0x60   :  { %v1622_v57 = vld [vmem:[#allocation7 + $0x74] ss:$8 sps:$4 sm:$0xff]   ;;  %v1624_v60 = vld [vmem:[#allocation7 + $0x70] ss:$8 sps:$4 sm:$0xff]   ;;  %v1625_v61 = vld [vmem:[#allocation7 + $0x84] ss:$8 sps:$4 sm:$0xff]  }
  0x61   :  { %506 = vmatpush1.bf16.msra.mxu1 %v1522_v11  ;;  %v1627_v0 = vld [vmem:[#allocation7 + $0x80] ss:$8 sps:$4 sm:$0xff]   ;;  %v1628_v1 = vld [vmem:[#allocation7 + $0x94] ss:$8 sps:$4 sm:$0xff]   ;;  %v1630_v4 = vld [vmem:[#allocation7 + $0x90] ss:$8 sps:$4 sm:$0xff]   ;;  %p1808_p7 = por %p1807_p6, %p1806_p5 }
  0x62   :  { %507 = vmatprep.subr.bf16.mxu1 %v1523_v12  ;;  %1010 = vmatpush1.bf16.msra.mxu0 %v1609_v37  ;;  %v1631_v5 = vld [vmem:[#allocation7 + $0xa4] ss:$8 sps:$4 sm:$0xff]   ;;  %v1633_v8 = vld [vmem:[#allocation7 + $0xa0] ss:$8 sps:$4 sm:$0xff]   ;;  %v1634_v9 = vld [vmem:[#allocation7 + $0xb4] ss:$8 sps:$4 sm:$0xff]  }
  0x63   :  { %1011 = vmatprep.subr.bf16.mxu0 %v1610_v38  ;;  %v1573_v7 = vld [vmem:[#allocation5 + $0xcc] ss:$16 sps:$4 sm:$0xff]   ;;  %v1571_v10 = vld [vmem:[#allocation5 + $0xc8] ss:$16 sps:$4 sm:$0xff]   ;;  %v1702_v44 = vld [vmem:[#allocation8 + $0x10] sm:$0xff]   ;;  %p1809_p8 = pnand %p1808_p7, %p1802_p4 }
  0x64   :  { %v1576_v11 = vld [vmem:[#allocation5 + $0xec] ss:$16 sps:$4 sm:$0xff]   ;;  %v1636_v12 = vld [vmem:[#allocation7 + $0xb0] ss:$8 sps:$4 sm:$0xff]  }
  0x65   :  { %508 = vmatpush1.bf16.msra.mxu1 %v1525_v16  ;;  %v1637_v13 = vld [vmem:[#allocation7 + $0xc4] ss:$8 sps:$4 sm:$0xff]   ;;  %v1574_v14 = vld [vmem:[#allocation5 + $0xe8] ss:$16 sps:$4 sm:$0xff]  }
  0x66   :  { %509 = vmatprep.subr.bf16.mxu1 %v1526_v17  ;;  %1012 = vmatpush1.bf16.msra.mxu0 %v1612_v41  ;;  %v1639_v16 = vld [vmem:[#allocation7 + $0xc0] ss:$8 sps:$4 sm:$0xff]   ;;  %v1597_v28 = vld [vmem:[#allocation5 + $0x1cc] ss:$16 sps:$4 sm:$0xff]   ;;  %v1642_v33 = vld [vmem:[#allocation7 + $0xd0] ss:$8 sps:$4 sm:$0xff]  }
  0x67   :  { %1013 = vmatprep.subr.bf16.mxu0 %v1613_v42  ;;  %v1577_v17 = vld [vmem:[#allocation5 + $0x108] ss:$16 sps:$4 sm:$0xff]   ;;  %v1643_v34 = vld [vmem:[#allocation7 + $0xe4] ss:$8 sps:$4 sm:$0xff]  }
  0x68   :  { %v1595_v29 = vld [vmem:[#allocation5 + $0x1c8] ss:$16 sps:$4 sm:$0xff]   ;;  %v1651_v38 = vld [vmem:[#allocation7 + $0x104] ss:$8 sps:$4 sm:$0xff]  }
  0x69   :  { %510 = vmatpush1.bf16.msra.mxu1 %v1528_v18  ;;  %v1582_v18 = vld [vmem:[#allocation5 + $0x12c] ss:$16 sps:$4 sm:$0xff]   ;;  %v1598_v31 = vld [vmem:[#allocation5 + $0x1e8] ss:$16 sps:$4 sm:$0xff]  }
  0x6a   :  { %511 = vmatprep.subr.bf16.mxu1 %v1529_v19  ;;  %1014 = vmatpush1.bf16.msra.mxu0 %v1615_v47  ;;  %v1580_v19 = vld [vmem:[#allocation5 + $0x128] ss:$16 sps:$4 sm:$0xff]   ;;  %v1705_v47 = vld [vmem:[#allocation8 + $0x60] sm:$0xff]  }
  0x6b   :  { %1015 = vmatprep.subr.bf16.mxu0 %v1616_v48  ;;  %v1648_v37 = vld [vmem:[#allocation7 + $0xf0] ss:$8 sps:$4 sm:$0xff]   ;;  %v1699_v41 = vld [vmem:[#allocation8 + $0x48] sm:$0xff]   ;;  %v1706_v48 = vld [vmem:[#allocation8 + $0x20] sm:$0xff]  }
  0x6c   :  { %v1700_v42 = vld [vmem:[#allocation8 + $0x8] sm:$0xff]   ;;  %v1703_v45 = vld [vmem:[#allocation8 + $0x58] sm:$0xff]  }
  0x6d   :  { %512 = vmatpush1.bf16.msra.mxu1 %v1531_v20  ;;  %v1585_v20 = vld [vmem:[#allocation5 + $0x14c] ss:$16 sps:$4 sm:$0xff]  }
  0x6e   :  { %513 = vmatprep.subr.bf16.mxu1 %v1532_v21  ;;  %1016 = vmatpush1.bf16.msra.mxu0 %v1618_v52  ;;  %v1583_v21 = vld [vmem:[#allocation5 + $0x148] ss:$16 sps:$4 sm:$0xff]   ;;  %v1954_v52 = vld [vmem:[%s1994_s2] sm:$0xf] }
  0x6f   :  { %1017 = vmatprep.subr.bf16.mxu0 %v1619_v53 }
  0x71   :  { %514 = vmatpush1.bf16.msra.mxu1 %v1534_v22  ;;  %v1588_v22 = vld [vmem:[#allocation5 + $0x16c] ss:$16 sps:$4 sm:$0xff]  }
  0x72   :  { %515 = vmatprep.subr.bf16.mxu1 %v1535_v23  ;;  %1018 = vmatpush1.bf16.msra.mxu0 %v1621_v56  ;;  %v1586_v23 = vld [vmem:[#allocation5 + $0x168] ss:$16 sps:$4 sm:$0xff]  }
  0x73   :  { %1019 = vmatprep.subr.bf16.mxu0 %v1622_v57 }
  0x75   :  { %516 = vmatpush1.bf16.msra.mxu1 %v1537_v24  ;;  %v1591_v24 = vld [vmem:[#allocation5 + $0x18c] ss:$16 sps:$4 sm:$0xff]  }
  0x76   :  { %517 = vmatprep.subr.bf16.mxu1 %v1538_v25  ;;  %1020 = vmatpush1.bf16.msra.mxu0 %v1624_v60  ;;  %v1589_v25 = vld [vmem:[#allocation5 + $0x188] ss:$16 sps:$4 sm:$0xff]  }
  0x77   :  { %1021 = vmatprep.subr.bf16.mxu0 %v1625_v61 }
  0x79   :  { %518 = vmatpush1.bf16.msra.mxu1 %v1540_v26  ;;  %v1594_v26 = vld [vmem:[#allocation5 + $0x1ac] ss:$16 sps:$4 sm:$0xff]  }
  0x7a   :  { %519 = vmatprep.subr.bf16.mxu1 %v1541_v27  ;;  %1022 = vmatpush1.bf16.msra.mxu0 %v1627_v0  ;;  %v1592_v27 = vld [vmem:[#allocation5 + $0x1a8] ss:$16 sps:$4 sm:$0xff]  }
  0x7b   :  { %1023 = vmatprep.subr.bf16.mxu0 %v1628_v1 }
  0x7d   :  { %520 = vmatpush1.bf16.msra.mxu1 %v1543_v30  ;;  %v1600_v30 = vld [vmem:[#allocation5 + $0x1ec] ss:$16 sps:$4 sm:$0xff]  }
  0x7e   :  { %521 = vmatprep.subr.bf16.mxu1 %v1544_v32  ;;  %1024 = vmatpush1.bf16.msra.mxu0 %v1630_v4  ;;  %v1640_v32 = vld [vmem:[#allocation7 + $0xd4] ss:$8 sps:$4 sm:$0xff]  }
  0x7f   :  { %1025 = vmatprep.subr.bf16.mxu0 %v1631_v5 }
  0x81   :  { %522 = vmatpush1.bf16.msra.mxu1 %v1546_v35  ;;  %v1645_v35 = vld [vmem:[#allocation7 + $0xe0] ss:$8 sps:$4 sm:$0xff]  }
  0x82   :  { %523 = vmatprep.subr.bf16.mxu1 %v1547_v36  ;;  %1026 = vmatpush1.bf16.msra.mxu0 %v1633_v8  ;;  %v1646_v36 = vld [vmem:[#allocation7 + $0xf4] ss:$8 sps:$4 sm:$0xff]  }
  0x83   :  { %1027 = vmatprep.subr.bf16.mxu0 %v1634_v9 }
  0x85   :  { %524 = vmatpush1.bf16.msra.mxu1 %v1549_v39  ;;  %v1697_v39 = vld [vmem:[#allocation8 + $0x40] sm:$0xff]  }
  0x86   :  { %525 = vmatprep.subr.bf16.mxu1 %v1550_v40  ;;  %1028 = vmatpush1.bf16.msra.mxu0 %v1636_v12  ;;  %v1698_v40 = vld [vmem:[#allocation8] sm:$0xff]   ;;  %v1652_v12 = vld [vmem:[#allocation7 + $0x110] ss:$8 sps:$4 sm:$0xff]  }
  0x87   :  { %1029 = vmatprep.subr.bf16.mxu0 %v1637_v13  ;;  %v1657_v13 = vld [vmem:[#allocation7 + $0x124] ss:$8 sps:$4 sm:$0xff]  }
  0x89   :  { %526 = vmatpush1.bf16.msra.mxu1 %v1552_v43  ;;  %v1701_v43 = vld [vmem:[#allocation8 + $0x50] sm:$0xff]  }
  0x8a   :  { %538 = vmatprep.subr.bf16.mxu1 %v1555_v46  ;;  %1030 = vmatpush1.bf16.msra.mxu0 %v1639_v16  ;;  %v1704_v46 = vld [vmem:[#allocation8 + $0x18] sm:$0xff]  }
  0x8b   :  { %1031 = vmatprep.subr.bf16.mxu0 %v1640_v32  ;;  %v1658_v16 = vld [vmem:[#allocation7 + $0x130] ss:$8 sps:$4 sm:$0xff]  }
  0x8c   :  { %528 = vmatmul.mubr.bf16.vlgmr.msra.gmra.mrb[0].mxu1 %v1943_v50  ;;  %v1682_v32 = vld [vmem:[#allocation7 + $0x1b0] ss:$8 sps:$4 sm:$0xff]  }
  0x8d   :  { %539 = vmatpush1.bf16.msra.mxu1 %v1553_v49  ;;  %570 = vmatprep.mubr.bf16.mxu1 %v1940_v15  ;;  %v1579_v15 = vld [vmem:[#allocation5 + $0x10c] ss:$16 sps:$4 sm:$0xff]   ;;  %v155_v49 = vlaneseq }
  0x8e   :  { %540 = vmatprep.subr.bf16.mxu1 %v1558_v51  ;;  %1032 = vmatpush1.bf16.msra.mxu0 %v1642_v33  ;;  %v1687_v33 = vld [vmem:[#allocation7 + $0x1c4] ss:$8 sps:$4 sm:$0xff]  }
  0x8f   :  { %1033 = vmatprep.subr.bf16.mxu0 %v1643_v34  ;;  %v1685_v34 = vld [vmem:[#allocation7 + $0x1c0] ss:$8 sps:$4 sm:$0xff]  }
  0x91   :  { %541 = vmatpush1.bf16.msra.mxu1 %v1556_v54 }
  0x92   :  { %542 = vmatprep.subr.bf16.mxu1 %v1561_v55  ;;  %1034 = vmatpush1.bf16.msra.mxu0 %v1645_v35 }
  0x93   :  { %1035 = vmatprep.subr.bf16.mxu0 %v1646_v36  ;;  %v1690_v36 = vld [vmem:[#allocation7 + $0x1d4] ss:$8 sps:$4 sm:$0xff]  }
  0x95   :  { %543 = vmatpush1.bf16.msra.mxu1 %v1559_v58 }
  0x96   :  { %544 = vmatprep.subr.bf16.mxu1 %v1564_v59  ;;  %1036 = vmatpush1.bf16.msra.mxu0 %v1648_v37 }
  0x97   :  { %1048 = vmatprep.subr.bf16.mxu0 %v1651_v38 }
  0x99   :  { %545 = vmatpush1.bf16.msra.mxu1 %v1562_v62 }
  0x9a   :  { %546 = vmatprep.subr.bf16.mxu1 %v1567_v63 }
  0x9d   :  { %547 = vmatpush1.bf16.msra.mxu1 %v1565_v2 }
  0x9e   :  { %548 = vmatprep.subr.bf16.mxu1 %v1570_v3 }
  0xa1   :  { %549 = vmatpush1.bf16.msra.mxu1 %v1568_v6 }
  0xa2   :  { %550 = vmatprep.subr.bf16.mxu1 %v1573_v7 }
  0xa5   :  { %551 = vmatpush1.bf16.msra.mxu1 %v1571_v10  ;;  %v1649_v10 = vld [vmem:[#allocation7 + $0x100] ss:$8 sps:$4 sm:$0xff]  }
  0xa6   :  { %552 = vmatprep.subr.bf16.mxu1 %v1576_v11  ;;  %v1654_v11 = vld [vmem:[#allocation7 + $0x114] ss:$8 sps:$4 sm:$0xff]  }
  0xa9   :  { %553 = vmatpush1.bf16.msra.mxu1 %v1574_v14  ;;  %v1655_v14 = vld [vmem:[#allocation7 + $0x120] ss:$8 sps:$4 sm:$0xff]  }
  0xaa   :  { %554 = vmatprep.subr.bf16.mxu1 %v1579_v15  ;;  %v1660_v15 = vld [vmem:[#allocation7 + $0x134] ss:$8 sps:$4 sm:$0xff]  }
  0xad   :  { %555 = vmatpush1.bf16.msra.mxu1 %v1577_v17  ;;  %v1663_v17 = vld [vmem:[#allocation7 + $0x144] ss:$8 sps:$4 sm:$0xff]  }
  0xae   :  { %556 = vmatprep.subr.bf16.mxu1 %v1582_v18  ;;  %v1661_v18 = vld [vmem:[#allocation7 + $0x140] ss:$8 sps:$4 sm:$0xff]  }
  0xb1   :  { %557 = vmatpush1.bf16.msra.mxu1 %v1580_v19  ;;  %v1666_v19 = vld [vmem:[#allocation7 + $0x154] ss:$8 sps:$4 sm:$0xff]  }
  0xb2   :  { %558 = vmatprep.subr.bf16.mxu1 %v1585_v20  ;;  %v1664_v20 = vld [vmem:[#allocation7 + $0x150] ss:$8 sps:$4 sm:$0xff]  }
  0xb5   :  { %559 = vmatpush1.bf16.msra.mxu1 %v1583_v21  ;;  %v1669_v21 = vld [vmem:[#allocation7 + $0x164] ss:$8 sps:$4 sm:$0xff]  }
  0xb6   :  { %560 = vmatprep.subr.bf16.mxu1 %v1588_v22  ;;  %v1667_v22 = vld [vmem:[#allocation7 + $0x160] ss:$8 sps:$4 sm:$0xff]  }
  0xb9   :  { %561 = vmatpush1.bf16.msra.mxu1 %v1586_v23  ;;  %v1672_v23 = vld [vmem:[#allocation7 + $0x174] ss:$8 sps:$4 sm:$0xff]  }
  0xba   :  { %562 = vmatprep.subr.bf16.mxu1 %v1591_v24  ;;  %v1670_v24 = vld [vmem:[#allocation7 + $0x170] ss:$8 sps:$4 sm:$0xff]  }
  0xbd   :  { %563 = vmatpush1.bf16.msra.mxu1 %v1589_v25  ;;  %v1675_v25 = vld [vmem:[#allocation7 + $0x184] ss:$8 sps:$4 sm:$0xff]  }
  0xbe   :  { %564 = vmatprep.subr.bf16.mxu1 %v1594_v26  ;;  %v1673_v26 = vld [vmem:[#allocation7 + $0x180] ss:$8 sps:$4 sm:$0xff]  }
  0xc1   :  { %565 = vmatpush1.bf16.msra.mxu1 %v1592_v27  ;;  %v1678_v27 = vld [vmem:[#allocation7 + $0x194] ss:$8 sps:$4 sm:$0xff]  }
  0xc2   :  { %566 = vmatprep.subr.bf16.mxu1 %v1597_v28  ;;  %v1676_v28 = vld [vmem:[#allocation7 + $0x190] ss:$8 sps:$4 sm:$0xff]  }
  0xc5   :  { %567 = vmatpush1.bf16.msra.mxu1 %v1595_v29  ;;  %v1681_v29 = vld [vmem:[#allocation7 + $0x1a4] ss:$8 sps:$4 sm:$0xff]  }
  0xc6   :  { %568 = vmatprep.subr.bf16.mxu1 %v1600_v30  ;;  %v1679_v30 = vld [vmem:[#allocation7 + $0x1a0] ss:$8 sps:$4 sm:$0xff]  }
  0xc9   :  { %569 = vmatpush1.bf16.msra.mxu1 %v1598_v31  ;;  %v1684_v31 = vld [vmem:[#allocation7 + $0x1b4] ss:$8 sps:$4 sm:$0xff]  }
  0xca   :  { %1464 = vmatprep.subr.bf16.mxu1 %v1697_v39  ;;  %v1688_v39 = vld [vmem:[#allocation7 + $0x1d0] ss:$8 sps:$4 sm:$0xff]  }
  0xcc   :  { %571 = vmatmul.mubr.bf16.vlgmr.msra.gmra.mrb[4].mxu1 %v1943_v50  ;;  %v1948_v50 = vshrl.u32 %v155_v49, 7 }
  0xcd   :  { %1465 = vmatpush3.bf16.msra.mxu1 %v1698_v40 }
  0xce   :  { %1466 = vmatprep.subr.bf16.mxu1 %v1699_v41  ;;  %v157_v51 = vsub.s32 0, %v1948_v50  ;;  %v161_v53 = vsub.s32 1, %v1948_v50  ;;  %v165_v35 = vsub.s32 2, %v1948_v50  ;;  %v169_v37 = vsub.s32 3, %v1948_v50  ;;  %v1693_v41 = vld [vmem:[#allocation7 + $0x1e4] ss:$8 sps:$4 sm:$0xff]  }
  0xd0   :  { %v158_v54 = vrot.slane %v1954_v52, %v157_v51  ;;  %v162_v55 = vrot.slane %v1954_v52, %v161_v53  ;;  %v166_v38 = vrot.slane %v1954_v52, %v165_v35  ;;  %v170_v40 = vrot.slane %v1954_v52, %v169_v37  ;;  %v1694_v52 = vld [vmem:[#allocation7 + $0x1f0] ss:$8 sps:$4 sm:$0xff]  }
  0xd1   :  { %1467 = vmatpush3.bf16.msra.mxu1 %v1700_v42 }
  0xd2   :  { %1468 = vmatprep.subr.bf16.mxu1 %v1701_v43 }
  0xd5   :  { %1469 = vmatpush3.bf16.msra.mxu1 %v1702_v44 }
  0xd6   :  { %1470 = vmatprep.subr.bf16.mxu1 %v1703_v45  ;;  %v1691_v45 = vld [vmem:[#allocation7 + $0x1e0] ss:$8 sps:$4 sm:$0xff]  }
  0xd9   :  { %1471 = vmatpush3.bf16.msra.mxu1 %v1704_v46 }
  0xda   :  { %1472 = vmatprep.subr.bf16.mxu1 %v1705_v47 }
  0xdd   :  { %1473 = vmatpush3.bf16.msra.mxu1 %v1706_v48  ;;  %v1696_v48 = vld [vmem:[#allocation7 + $0x1f4] ss:$8 sps:$4 sm:$0xff]  }
 0x15f   :  { %v529_v56 = vpop.f32.mrb[0].mxu1 }
 0x160   :  { %v530_v57 = vadd.f32 %v529_v56, %v158_v54  ;;  %v531_v58 = vpop.f32.mrb[1].mxu1 }
 0x161   :  { %v532_v59 = vadd.f32 %v531_v58, %v162_v55  ;;  %v533_v60 = vpop.f32.mrb[2].mxu1 }
 0x162   :  { %v589_v61 = vmul.f32 0.2, %v530_v57  ;;  %v534_v62 = vadd.f32 %v533_v60, %v158_v54  ;;  %v535_v63 = vpop.f32.mrb[3].mxu1  ;;  %vm581_vm0 = vcmp.gt.f32.partialorder %v530_v57, 0.0 }
 0x163   :  { %v590_v0 = vmul.f32 0.2, %v532_v59  ;;  %v536_v1 = vadd.f32 %v535_v63, %v162_v55  ;;  %vm582_vm2 = vcmp.gt.f32.partialorder %v532_v59, 0.0 }
 0x164   :  { %vm585_vm1 = vcmp.gt.f32.partialorder %v534_v62, 0.0  ;;  %v593_v2 = vmul.f32 0.2, %v534_v62  ;;  %v597_v4 = vsel %vm581_vm0, %v530_v57, %v589_v61 }
 0x165   :  { %v594_v3 = vmul.f32 0.2, %v536_v1  ;;  %vm586_vm3 = vcmp.gt.f32.partialorder %v536_v1, 0.0  ;;  %v598_v6 = vsel %vm582_vm2, %v532_v59, %v590_v0 }
 0x166   :  { %v601_v5 = vsel %vm585_vm1, %v534_v62, %v593_v2  ;;  %v1707_v2 = vld [vmem:[#allocation8 + $0x68] sm:$0xff]  }
 0x167   :  { %v602_v7 = vsel %vm586_vm3, %v536_v1, %v594_v3  ;;  %v605_v8 = vpack.c.bf16 %v601_v5, %v597_v4  ;;  %v1708_v3 = vld [vmem:[#allocation8 + $0x28] sm:$0xff]   ;;  %1474 = vmatprep.subr.bf16.mxu1 %v1707_v2  ;;  %v1709_v4 = vld [vmem:[#allocation8 + $0x70] sm:$0xff]  }
 0x168   :  { %v606_v9 = vpack.c.bf16 %v602_v7, %v598_v6  ;;  %1475 = vmatpush3.bf16.msra.mxu1 %v1708_v3  ;;  %v1710_v5 = vld [vmem:[#allocation8 + $0x30] sm:$0xff]   ;;  %v1711_v6 = vld [vmem:[#allocation8 + $0x78] sm:$0xff]  }
 0x169   :  { %1476 = vmatprep.subr.bf16.mxu1 %v1709_v4  ;;  %v1712_v7 = vld [vmem:[#allocation8 + $0x38] sm:$0xff]  }
 0x16a   :  { %1037 = vmatprep.mubr.bf16.mxu0 %v606_v9 }
 0x16b   :  { %1038 = vmatmul.mubr.bf16.vlgmr.msra.gmra.mrb[0].mxu0 %v605_v8  ;;  %v673_v8 = vld [vmem:[%s1996_s4] sm:$0x3] }
 0x16c   :  { %1049 = vmatpush1.bf16.msra.mxu0 %v1649_v10  ;;  %1477 = vmatpush3.bf16.msra.mxu1 %v1710_v5  ;;  %v678_v9 = vrot.slane %v673_v8, %v157_v51  ;;  %v682_v10 = vrot.slane %v673_v8, %v161_v53 }
 0x16d   :  { %1050 = vmatprep.subr.bf16.mxu0 %v1654_v11  ;;  %1478 = vmatprep.subr.bf16.mxu1 %v1711_v6 }
 0x170   :  { %1051 = vmatpush1.bf16.msra.mxu0 %v1652_v12  ;;  %1479 = vmatpush3.bf16.msra.mxu1 %v1712_v7 }
 0x171   :  { %1052 = vmatprep.subr.bf16.mxu0 %v1657_v13 }
 0x174   :  { %1053 = vmatpush1.bf16.msra.mxu0 %v1655_v14 }
 0x175   :  { %1054 = vmatprep.subr.bf16.mxu0 %v1660_v15 }
 0x178   :  { %1055 = vmatpush1.bf16.msra.mxu0 %v1658_v16 }
 0x179   :  { %1056 = vmatprep.subr.bf16.mxu0 %v1663_v17 }
 0x17c   :  { %1057 = vmatpush1.bf16.msra.mxu0 %v1661_v18 }
 0x17d   :  { %1058 = vmatprep.subr.bf16.mxu0 %v1666_v19 }
 0x180   :  { %1059 = vmatpush1.bf16.msra.mxu0 %v1664_v20 }
 0x181   :  { %1060 = vmatprep.subr.bf16.mxu0 %v1669_v21 }
 0x184   :  { %1061 = vmatpush1.bf16.msra.mxu0 %v1667_v22 }
 0x185   :  { %1062 = vmatprep.subr.bf16.mxu0 %v1672_v23 }
 0x188   :  { %1063 = vmatpush1.bf16.msra.mxu0 %v1670_v24 }
 0x189   :  { %1064 = vmatprep.subr.bf16.mxu0 %v1675_v25 }
 0x18c   :  { %1065 = vmatpush1.bf16.msra.mxu0 %v1673_v26 }
 0x18d   :  { %1066 = vmatprep.subr.bf16.mxu0 %v1678_v27 }
 0x190   :  { %1067 = vmatpush1.bf16.msra.mxu0 %v1676_v28 }
 0x191   :  { %1068 = vmatprep.subr.bf16.mxu0 %v1681_v29 }
 0x194   :  { %1069 = vmatpush1.bf16.msra.mxu0 %v1679_v30  ;;  %v1438_v30 = vld [vmem:[%s1998_s6] ss:$0 sm:$0xff] }
 0x195   :  { %1070 = vmatprep.subr.bf16.mxu0 %v1684_v31 }
 0x198   :  { %1071 = vmatpush1.bf16.msra.mxu0 %v1682_v32 }
 0x199   :  { %1072 = vmatprep.subr.bf16.mxu0 %v1687_v33 }
 0x19c   :  { %1073 = vmatpush1.bf16.msra.mxu0 %v1685_v34 }
 0x19d   :  { %1074 = vmatprep.subr.bf16.mxu0 %v1690_v36 }
 0x19f   :  { %v572_v42 = vpop.f32.mrb[4].mxu1 }
 0x1a0   :  { %v573_v43 = vadd.f32 %v572_v42, %v166_v38  ;;  %v574_v44 = vpop.f32.mrb[5].mxu1  ;;  %1075 = vmatpush1.bf16.msra.mxu0 %v1688_v39 }
 0x1a1   :  { %v575_v46 = vadd.f32 %v574_v44, %v170_v40  ;;  %v576_v47 = vpop.f32.mrb[6].mxu1  ;;  %1076 = vmatprep.subr.bf16.mxu0 %v1693_v41 }
 0x1a2   :  { %v591_v49 = vmul.f32 0.2, %v573_v43  ;;  %v577_v54 = vadd.f32 %v576_v47, %v166_v38  ;;  %v578_v55 = vpop.f32.mrb[7].mxu1  ;;  %vm583_vm4 = vcmp.gt.f32.partialorder %v573_v43, 0.0 }
 0x1a3   :  { %v592_v56 = vmul.f32 0.2, %v575_v46  ;;  %v579_v57 = vadd.f32 %v578_v55, %v170_v40  ;;  %vm584_vm5 = vcmp.gt.f32.partialorder %v575_v46, 0.0 }
 0x1a4   :  { %vm587_vm6 = vcmp.gt.f32.partialorder %v577_v54, 0.0  ;;  %v595_v58 = vmul.f32 0.2, %v577_v54  ;;  %1077 = vmatpush1.bf16.msra.mxu0 %v1691_v45  ;;  %v599_v60 = vsel %vm583_vm4, %v573_v43, %v591_v49 }
 0x1a5   :  { %vm588_vm7 = vcmp.gt.f32.partialorder %v579_v57, 0.0  ;;  %v596_v59 = vmul.f32 0.2, %v579_v57  ;;  %1078 = vmatprep.subr.bf16.mxu0 %v1696_v48  ;;  %v600_v63 = vsel %vm584_vm5, %v575_v46, %v592_v56 }
 0x1a6   :  { %v603_v61 = vsel %vm587_vm6, %v577_v54, %v595_v58 }
 0x1a7   :  { %v607_v62 = vpack.c.bf16 %v603_v61, %v599_v60  ;;  %v604_v0 = vsel %vm588_vm7, %v579_v57, %v596_v59 }
 0x1a8   :  { %1079 = vmatpush1.bf16.msra.mxu0 %v1694_v52  ;;  %v608_v1 = vpack.c.bf16 %v604_v0, %v600_v63 }
 0x1aa   :  { %1080 = vmatprep.mubr.bf16.mxu0 %v608_v1 }
 0x1ab   :  { %1081 = vmatmul.mubr.bf16.vlgmr.msra.gmra.mrb[0].mxu0 %v607_v62 }
 0x27e   :  { %v1082_v11 = vpop.f32.mrb[0].mxu0 }
 0x27f   :  { %v1486_v12 = vadd.f32 %v1082_v11, %v678_v9  ;;  %v1084_v13 = vpop.f32.mrb[1].mxu0 }
 0x280   :  { %v1487_v14 = vadd.f32 %v1084_v13, %v682_v10  ;;  %v1086_v15 = vpop.f32.mrb[2].mxu0 }
 0x281   :  { %v1095_v16 = vmul.f32 0.2, %v1486_v12  ;;  %v1488_v17 = vadd.f32 %v1086_v15, %v678_v9  ;;  %v1088_v18 = vpop.f32.mrb[3].mxu0  ;;  %vm1091_vm8 = vcmp.gt.f32.partialorder %v1486_v12, 0.0 }
 0x282   :  { %v1096_v19 = vmul.f32 0.2, %v1487_v14  ;;  %v1489_v20 = vadd.f32 %v1088_v18, %v682_v10  ;;  %vm1092_vm9 = vcmp.gt.f32.partialorder %v1487_v14, 0.0 }
 0x283   :  { %vm1093_vm10 = vcmp.gt.f32.partialorder %v1488_v17, 0.0  ;;  %v1097_v21 = vmul.f32 0.2, %v1488_v17  ;;  %v1099_v51 = vsel %vm1091_vm8, %v1486_v12, %v1095_v16 }
 0x284   :  { %vm1094_vm11 = vcmp.gt.f32.partialorder %v1489_v20, 0.0  ;;  %v1098_v22 = vmul.f32 0.2, %v1489_v20  ;;  %v1100_v53 = vsel %vm1092_vm9, %v1487_v14, %v1096_v19 }
 0x285   :  { %v1101_v23 = vsel %vm1093_vm10, %v1488_v17, %v1097_v21 }
 0x286   :  { %v1103_v50 = vpack.c.bf16 %v1101_v23, %v1099_v51  ;;  %v1102_v24 = vsel %vm1094_vm11, %v1489_v20, %v1098_v22 }
 0x287   :  { %v1104_v25 = vpack.c.bf16 %v1102_v24, %v1100_v53 }
 0x289   :  { %1272 = vmatprep.mubr.bf16.mxu1 %v1104_v25 }
 0x28a   :  { %1273 = vmatmul.mubr.bf16.vlgmr.msra.gmra.mrb[8].mxu1 %v1103_v50 }
 0x35d   :  { %v1480_v26 = vpop.f32.mrb[8].mxu1 }
 0x35e   :  { %v1481_v27 = vpop.f32.mrb[9].mxu1 }
 0x35f   :  { %v1482_v28 = vadd.f32 %v1481_v27, %v1480_v26  ;;  %v1483_v29 = vpop.f32.mrb[10].mxu1 }
 0x360   :  { %v1484_v31 = vpop.f32.mrb[11].mxu1 }
 0x361   :  { %v1485_v32 = vadd.f32 %v1484_v31, %v1483_v29  ;;  %v1275_v33 = vadd.f32 %v1482_v28, %v1438_v30 }
 0x363   :  { %v1278_v34 = vadd.f32 %v1485_v32, %v1438_v30 }
 0x365   :  { %v1462_v35 = vpack.c.bf16 %v1278_v34, %v1275_v33 }
 0x367   :  { %1463 = vst [vmem:[#allocation10] sm:$0xff] %v1462_v35  }
 0x368   :  { %1812 = shalt.err (!%p1809_p8)
}
 0x369   :  { %s1813_s6 = scalar_lea.hbm %s1999_s7, 128 }
 0x36a   :  { %p1814_p9 = scmp.ne.s32.totalorder %s1999_s7, %s1813_s6  ;;  %p1817_p10 = scmp.lt.u32.totalorder %s1813_s6, %s1999_s7 }
 0x36c   :  { %p1819_p11 = pnand %p1817_p10, %p1814_p9 }
 0x36e   :  { %1822 = shalt.err (!%p1819_p11)
}
 0x36f   :  { %1302 = dma.vmem_to_hbm [thread:$0]  %s1297_s10, 128, %s1999_s7, [#allocation4], %s1839_s3, %s1839_s3, %s1840_s25  }
 0x370   :  { %1829 = dma.done.wait [#allocation4], 128  }
 0x371   :  { %1830 = vsyncadd [#allocation4], 4294967168 }
 0x372   :  { %1306 = vsyncpa [#allocation3], 1 }
 0x373   :  { %1307 = vsyncpa [#allocation6], 1 }
 0x374   :  { %1308 = vsyncpa [#allocation9], 1 }
 0x375   :  { %1309 = vsyncpa [#allocation4], 1 }

</bundles_post_ra>
